<compile_context>
chip_gen: v7x
topology: tpu7x:2x2x1
jax: 0.10.0
libtpu: 0.0.40
codegen_flags: <defaults>
</compile_context>

<pallas_src>
import math

import numpy as np
import jax
import jax.numpy as jnp
from jax.experimental import pallas as pl
from jax.experimental.pallas import tpu as pltpu


# ----------------------------------------------------------------------------
# Fused Pallas kernel (one batch element per grid step)
# ----------------------------------------------------------------------------
def _fused_lrlc_kernel(x_ref, awt_ref, L_ref, bd_ref, wlc_ref, blc_ref,
                       P_ref, bp_ref, o_ref):
    # x_ref: (1, Cin*H, W) slab of one batch element, NCHW row order.
    x = x_ref[0]                                                        # (Cin*H, W)

    # W pass of the separable bilinear resize (align_corners=True).
    t = jnp.dot(x, awt_ref[...], preferred_element_type=jnp.float32)    # (Cin*H, Wout)

    # H pass fused with the 1x1 dim-reduction conv (L = kron(w_dim^T, Ah)).
    # The conv bias is added afterwards: bilinear rows sum to 1, so
    # resize(conv(x) + b) == resize(conv(x)) + b.
    z = jnp.dot(L_ref[...], t,
                preferred_element_type=jnp.float32) + bd_ref[...]       # (C*Hout, Wout)

    # Depthwise locally-connected layer (kernel_size=1): per-(c,h,w) scale+bias.
    y = z * wlc_ref[...] + blc_ref[...]                                  # (C*Hout, Wout)

    # 1x1 transposed-conv projection folded as P = kron(w_proj^T, I_Hout).
    p = jnp.dot(P_ref[...], y,
                preferred_element_type=jnp.float32) + bp_ref[...]       # (rank*Hout, Wout)

    # Softmax over the W axis (== dim=-1 of the NCHW output): row-wise over lanes.
    p = p - jnp.max(p, axis=-1, keepdims=True)
    e = jnp.exp(p)
    inv = pl.reciprocal(jnp.sum(e, axis=-1, keepdims=True), approx=True)
    o_ref[0] = e * inv


# ----------------------------------------------------------------------------
# Helpers
# ----------------------------------------------------------------------------
def _bilinear_matrix(s_in, s_out):
    """Row-stochastic matrix equivalent to F.interpolate(bilinear, align_corners=True)."""
    if s_in == 1:
        return np.ones((s_out, 1), np.float32)
    A = np.zeros((s_out, s_in), np.float32)
    for o in range(s_out):
        src = 0.0 if s_out == 1 else o * (s_in - 1) / (s_out - 1)
        lo = int(math.floor(src))
        hi = min(lo + 1, s_in - 1)
        f = src - lo
        A[o, lo] += 1.0 - f
        A[o, hi] += f
    return A


def _uniform(key, shape, bound):
    return jax.random.uniform(key, shape, jnp.float32, -bound, bound)


# ----------------------------------------------------------------------------
# Module
# ----------------------------------------------------------------------------
class LocallyConnectedCombiningWeightsPallas:
    def __init__(self, rank, output_shape, in_channels, low_dim_channels,
                 compression=1, key=None):
        if compression != 1:
            # TODO(synk): strided compression path not implemented (the upstream
            # DepthwiseLocallyConnected source was not provided); compression=1
            # is the module default and the only configuration ported here.
            raise NotImplementedError("only compression=1 is supported")

        self.rank = rank
        self.size = tuple(output_shape)
        self.in_channels = in_channels
        self.low_dim = low_dim_channels
        Hout, Wout = self.size
        C = low_dim_channels

        if key is None:
            key = jax.random.PRNGKey(0)
        k = iter(jax.random.split(key, 6))

        # dim_reduction_layer: Conv2d(in_channels, C, kernel_size=1, bias=True)
        bd = 1.0 / math.sqrt(in_channels)
        self.w_dim = _uniform(next(k), (in_channels, C), bd)     # (Cin, C)
        self.b_dim = _uniform(next(k), (C,), bd)
        # lc_layer: DepthwiseLocallyConnected(output_shape, C, kernel_size=1)
        # assumed semantics (source not provided): per-location, per-channel
        # scale + bias on an (Hout, Wout) map.
        self.w_lc = _uniform(next(k), (C, Hout, Wout), 1.0)
        self.b_lc = _uniform(next(k), (C, Hout, Wout), 1.0)
        # proj_layer: ConvTranspose2d(C, rank, kernel_size=1, bias=True)
        bp = 1.0 / math.sqrt(C)
        self.w_proj = _uniform(next(k), (C, rank), bp)           # (C, rank)
        self.b_proj = _uniform(next(k), (rank,), bp)

        # ---- kernel-side constants that depend only on static module config ----
        self._wlc2 = self.w_lc.reshape(C * Hout, Wout)
        self._blc2 = self.b_lc.reshape(C * Hout, Wout)
        self._bd_col = jnp.repeat(self.b_dim, Hout).reshape(C * Hout, 1)
        self._bp_col = jnp.repeat(self.b_proj, Hout).reshape(rank * Hout, 1)
        # projection folded with an identity over Hout so the kernel's final
        # slab (rank*Hout, Wout) is already in NCHW row order.
        self._P = jnp.asarray(
            np.kron(np.asarray(self.w_proj).T, np.eye(Hout, dtype=np.float32)))
        # resize constants are cached lazily per input spatial size.
        self._resize_cache = {}

    def _resize_consts(self, H, W):
        key = (H, W)
        if key not in self._resize_cache:
            Hout, Wout = self.size
            Ah = _bilinear_matrix(H, Hout)                                # (Hout, H)
            Aw = _bilinear_matrix(W, Wout)                                # (Wout, W)
            AwT = jnp.asarray(Aw.T)                                       # (W, Wout)
            # H pass fused with the 1x1 dim-reduction (separable resize).
            L = jnp.asarray(np.kron(np.asarray(self.w_dim).T, Ah))        # (C*Hout, Cin*H)
            self._resize_cache[key] = (AwT, L)
        return self._resize_cache[key]

    # ------------------------------------------------------------------ Pallas
    def forward(self, x_nchw):
        x = x_nchw.astype(jnp.float32)
        N, Cin, H, W = x.shape
        assert Cin == self.in_channels
        Hout, Wout = self.size
        C, rank = self.low_dim, self.rank
        AwT, L = self._resize_consts(H, W)

        # free, contiguous reshape -- keeps NCHW row order, no transpose.
        x2 = x.reshape(N, Cin * H, W)

        out = pl.pallas_call(
            _fused_lrlc_kernel,
            out_shape=jax.ShapeDtypeStruct((N, rank * Hout, Wout), jnp.float32),
            grid=(N,),
            in_specs=[
                pl.BlockSpec((1, Cin * H, W), lambda n: (n, 0, 0)),      # x (per n)
                pl.BlockSpec((W, Wout), lambda n: (0, 0)),               # Aw^T
                pl.BlockSpec((C * Hout, Cin * H), lambda n: (0, 0)),     # kron(w_dim^T, Ah)
                pl.BlockSpec((C * Hout, 1), lambda n: (0, 0)),           # dim-reduction bias
                pl.BlockSpec((C * Hout, Wout), lambda n: (0, 0)),        # LC weight
                pl.BlockSpec((C * Hout, Wout), lambda n: (0, 0)),        # LC bias
                pl.BlockSpec((rank * Hout, C * Hout), lambda n: (0, 0)), # kron(w_proj^T, I_H)
                pl.BlockSpec((rank * Hout, 1), lambda n: (0, 0)),        # projection bias
            ],
            out_specs=pl.BlockSpec((1, rank * Hout, Wout), lambda n: (n, 0, 0)),
            compiler_params=pltpu.CompilerParams(
                dimension_semantics=("parallel",),
                vmem_limit_bytes=32 * 1024 * 1024),
        )(x2, AwT, L, self._bd_col, self._wlc2, self._blc2, self._P, self._bp_col)

        # free reshape back to NCHW (rows are already (rank, Hout) major-order).
        return out.reshape(N, rank, Hout, Wout)

    # --------------------------------------------------------- pure-JAX reference
    def reference_forward(self, x_nchw):
        x = x_nchw.astype(jnp.float32)
        N, Cin, H, W = x.shape
        Hout, Wout = self.size
        xl = jnp.einsum('nihw,ic->nchw', x, self.w_dim) \
            + self.b_dim[None, :, None, None]
        Ah = jnp.asarray(_bilinear_matrix(H, Hout))
        Aw = jnp.asarray(_bilinear_matrix(W, Wout))
        xr = jnp.einsum('oh,pw,nchw->ncop', Ah, Aw, xl)
        xlc = xr * self.w_lc[None] + self.b_lc[None]
        out = jnp.einsum('nchw,cr->nrhw', xlc, self.w_proj) \
            + self.b_proj[None, :, None, None]
        return jax.nn.softmax(out, axis=-1)


if __name__ == "__main__":
    rank = 4
    in_channels = 4
    low_dim_channels = 8
    input_shape = (12, 12)      # input spatial != output -> exercises bilinear resize
    output_shape = (16, 16)
    N = 2

    key = jax.random.PRNGKey(0)
    kx, kp = jax.random.split(key)
    x = jax.random.normal(kx, (N, in_channels, *input_shape), jnp.float32)

    mod = LocallyConnectedCombiningWeightsPallas(
        rank, output_shape, in_channels, low_dim_channels, compression=1, key=kp)

    out = jax.block_until_ready(mod.forward(x))
    assert out.shape == (N, rank, *output_shape)

    ref = jax.block_until_ready(mod.reference_forward(x))
    np.testing.assert_allclose(np.asarray(out), np.asarray(ref), rtol=2e-2, atol=5e-3)
    # softmax is over the last (W) axis of the NCHW output
    assert np.allclose(np.asarray(out).sum(axis=-1), 1.0, atol=1e-2)

    print("KERNEL_OK")
</pallas_src>

<mosaic_0001>
module attributes {stable_mosaic.version = 11 : i64} {
  func.func @_fused_lrlc_kernel(%arg0: i32, %arg1: memref<1x48x12xf32, #tpu.memory_space<vmem>>, %arg2: memref<12x16xf32, #tpu.memory_space<vmem>>, %arg3: memref<128x48xf32, #tpu.memory_space<vmem>>, %arg4: memref<128x1xf32, #tpu.memory_space<vmem>>, %arg5: memref<128x16xf32, #tpu.memory_space<vmem>>, %arg6: memref<128x16xf32, #tpu.memory_space<vmem>>, %arg7: memref<64x128xf32, #tpu.memory_space<vmem>>, %arg8: memref<64x1xf32, #tpu.memory_space<vmem>>, %arg9: memref<1x64x16xf32, #tpu.memory_space<vmem>>) attributes {dimension_semantics = [#tpu.dimension_semantics<parallel>], iteration_bounds = array<i64: 2>, scalar_prefetch = 0 : i64, scratch_operands = 0 : i64, tpu.core_type = #tpu.core_type<tc>, window_params = [{transform_indices = @transform_0, window_bounds = array<i64: 1, 48, 12>}, {pipeline_mode = #tpu.pipeline_mode<synchronous>, transform_indices = @transform_1, window_bounds = array<i64: 12, 16>}, {pipeline_mode = #tpu.pipeline_mode<synchronous>, transform_indices = @transform_2, window_bounds = array<i64: 128, 48>}, {pipeline_mode = #tpu.pipeline_mode<synchronous>, transform_indices = @transform_3, window_bounds = array<i64: 128, 1>}, {pipeline_mode = #tpu.pipeline_mode<synchronous>, transform_indices = @transform_4, window_bounds = array<i64: 128, 16>}, {pipeline_mode = #tpu.pipeline_mode<synchronous>, transform_indices = @transform_5, window_bounds = array<i64: 128, 16>}, {pipeline_mode = #tpu.pipeline_mode<synchronous>, transform_indices = @transform_6, window_bounds = array<i64: 64, 128>}, {pipeline_mode = #tpu.pipeline_mode<synchronous>, transform_indices = @transform_7, window_bounds = array<i64: 64, 1>}, {transform_indices = @transform_8, window_bounds = array<i64: 1, 64, 16>}]} {
    %c0 = arith.constant 0 : index
    %c0_0 = arith.constant 0 : index
    %c0_1 = arith.constant 0 : index
    %0 = vector.load %arg1[%c0, %c0_0, %c0_1] : memref<1x48x12xf32, #tpu.memory_space<vmem>>, vector<1x48x12xf32>
    %1 = vector.shape_cast %0 : vector<1x48x12xf32> to vector<48x12xf32>
    %c0_2 = arith.constant 0 : index
    %c0_3 = arith.constant 0 : index
    %2 = vector.load %arg2[%c0_2, %c0_3] : memref<12x16xf32, #tpu.memory_space<vmem>>, vector<12x16xf32>
    %cst = arith.constant dense<0.000000e+00> : vector<48x16xf32>
    %3 = tpu.matmul %1, %2, %cst {dimension_numbers = #tpu.dot_dimension_numbers<[1], [0], [0], [1], [0, 0, 1, 1], [], []>} : vector<48x12xf32>, vector<12x16xf32>, vector<48x16xf32> -> vector<48x16xf32>
    %c0_4 = arith.constant 0 : index
    %c0_5 = arith.constant 0 : index
    %4 = vector.load %arg3[%c0_4, %c0_5] : memref<128x48xf32, #tpu.memory_space<vmem>>, vector<128x48xf32>
    %cst_6 = arith.constant dense<0.000000e+00> : vector<128x16xf32>
    %5 = tpu.matmul %4, %3, %cst_6 {dimension_numbers = #tpu.dot_dimension_numbers<[1], [0], [0], [1], [0, 0, 1, 1], [], []>} : vector<128x48xf32>, vector<48x16xf32>, vector<128x16xf32> -> vector<128x16xf32>
    %c0_7 = arith.constant 0 : index
    %c0_8 = arith.constant 0 : index
    %6 = vector.load %arg4[%c0_7, %c0_8] : memref<128x1xf32, #tpu.memory_space<vmem>>, vector<128x1xf32>
    %7 = vector.broadcast %6 : vector<128x1xf32> to vector<128x16xf32>
    %8 = arith.addf %5, %7 : vector<128x16xf32>
    %c0_9 = arith.constant 0 : index
    %c0_10 = arith.constant 0 : index
    %9 = vector.load %arg5[%c0_9, %c0_10] : memref<128x16xf32, #tpu.memory_space<vmem>>, vector<128x16xf32>
    %10 = arith.mulf %8, %9 : vector<128x16xf32>
    %c0_11 = arith.constant 0 : index
    %c0_12 = arith.constant 0 : index
    %11 = vector.load %arg6[%c0_11, %c0_12] : memref<128x16xf32, #tpu.memory_space<vmem>>, vector<128x16xf32>
    %12 = arith.addf %10, %11 : vector<128x16xf32>
    %c0_13 = arith.constant 0 : index
    %c0_14 = arith.constant 0 : index
    %13 = vector.load %arg7[%c0_13, %c0_14] : memref<64x128xf32, #tpu.memory_space<vmem>>, vector<64x128xf32>
    %cst_15 = arith.constant dense<0.000000e+00> : vector<64x16xf32>
    %14 = tpu.matmul %13, %12, %cst_15 {dimension_numbers = #tpu.dot_dimension_numbers<[1], [0], [0], [1], [0, 0, 1, 1], [], []>} : vector<64x128xf32>, vector<128x16xf32>, vector<64x16xf32> -> vector<64x16xf32>
    %c0_16 = arith.constant 0 : index
    %c0_17 = arith.constant 0 : index
    %15 = vector.load %arg8[%c0_16, %c0_17] : memref<64x1xf32, #tpu.memory_space<vmem>>, vector<64x1xf32>
    %16 = vector.broadcast %15 : vector<64x1xf32> to vector<64x16xf32>
    %17 = arith.addf %14, %16 : vector<64x16xf32>
    %cst_18 = arith.constant dense<0xFF800000> : vector<64xf32>
    %18 = vector.multi_reduction <maximumf>, %17, %cst_18 [1] : vector<64x16xf32> to vector<64xf32>
    %19 = vector.shape_cast %18 : vector<64xf32> to vector<64x1xf32>
    %20 = vector.broadcast %19 : vector<64x1xf32> to vector<64x16xf32>
    %21 = arith.subf %17, %20 : vector<64x16xf32>
    %22 = math.exp %21 : vector<64x16xf32>
    %cst_19 = arith.constant dense<0.000000e+00> : vector<64xf32>
    %23 = vector.multi_reduction <add>, %22, %cst_19 [1] : vector<64x16xf32> to vector<64xf32>
    %24 = vector.shape_cast %23 : vector<64xf32> to vector<64x1xf32>
    %25 = tpu.reciprocal %24 {approx = true} : vector<64x1xf32> -> vector<64x1xf32>
    %26 = vector.broadcast %25 : vector<64x1xf32> to vector<64x16xf32>
    %27 = arith.mulf %22, %26 : vector<64x16xf32>
    %c0_20 = arith.constant 0 : index
    %c0_21 = arith.constant 0 : index
    %c0_22 = arith.constant 0 : index
    %28 = vector.load %arg9[%c0_20, %c0_21, %c0_22] : memref<1x64x16xf32, #tpu.memory_space<vmem>>, vector<1x64x16xf32>
    %29 = vector.shape_cast %28 : vector<1x64x16xf32> to vector<64x16xf32>
    %30 = vector.shape_cast %27 : vector<64x16xf32> to vector<1x64x16xf32>
    tpu.vector_store %arg9[%c0_20, %c0_21, %c0_22], %30 {strides = array<i32>} : memref<1x64x16xf32, #tpu.memory_space<vmem>>, vector<1x64x16xf32>,
    return
  }
  func.func @transform_0(%arg0: i32) -> (i32, i32, i32) {
    %c0_i32 = arith.constant 0 : i32
    %c0_i32_0 = arith.constant 0 : i32
    %c0_i32_1 = arith.constant 0 : i32
    return %arg0, %c0_i32, %c0_i32_0 : i32, i32, i32
  }
  func.func @transform_1(%arg0: i32) -> (i32, i32) {
    %c0_i32 = arith.constant 0 : i32
    %c0_i32_0 = arith.constant 0 : i32
    %c0_i32_1 = arith.constant 0 : i32
    return %c0_i32, %c0_i32_0 : i32, i32
  }
  func.func @transform_2(%arg0: i32) -> (i32, i32) {
    %c0_i32 = arith.constant 0 : i32
    %c0_i32_0 = arith.constant 0 : i32
    %c0_i32_1 = arith.constant 0 : i32
    return %c0_i32, %c0_i32_0 : i32, i32
  }
  func.func @transform_3(%arg0: i32) -> (i32, i32) {
    %c0_i32 = arith.constant 0 : i32
    %c0_i32_0 = arith.constant 0 : i32
    %c0_i32_1 = arith.constant 0 : i32
    return %c0_i32, %c0_i32_0 : i32, i32
  }
  func.func @transform_4(%arg0: i32) -> (i32, i32) {
    %c0_i32 = arith.constant 0 : i32
    %c0_i32_0 = arith.constant 0 : i32
    %c0_i32_1 = arith.constant 0 : i32
    return %c0_i32, %c0_i32_0 : i32, i32
  }
  func.func @transform_5(%arg0: i32) -> (i32, i32) {
    %c0_i32 = arith.constant 0 : i32
    %c0_i32_0 = arith.constant 0 : i32
    %c0_i32_1 = arith.constant 0 : i32
    return %c0_i32, %c0_i32_0 : i32, i32
  }
  func.func @transform_6(%arg0: i32) -> (i32, i32) {
    %c0_i32 = arith.constant 0 : i32
    %c0_i32_0 = arith.constant 0 : i32
    %c0_i32_1 = arith.constant 0 : i32
    return %c0_i32, %c0_i32_0 : i32, i32
  }
  func.func @transform_7(%arg0: i32) -> (i32, i32) {
    %c0_i32 = arith.constant 0 : i32
    %c0_i32_0 = arith.constant 0 : i32
    %c0_i32_1 = arith.constant 0 : i32
    return %c0_i32, %c0_i32_0 : i32, i32
  }
  func.func @transform_8(%arg0: i32) -> (i32, i32, i32) {
    %c0_i32 = arith.constant 0 : i32
    %c0_i32_0 = arith.constant 0 : i32
    %c0_i32_1 = arith.constant 0 : i32
    return %arg0, %c0_i32, %c0_i32_0 : i32, i32, i32
  }
}

</mosaic_0001>

<bundles_post_ra>
// kernel: tpu_custom_call.1
= control target key start
LH: loop header
LB: loop body
LE: loop exit
PB: predicated region body
PF: predicated region fallthrough
CT: control target
= control target key end

     0   :  { %s1446_s27 = smov 0   ;;  %s1763_s0 = inlined_call_operand.vmem [shape: f32[2,48,12], index: 0, kind: input, shape index: {}]   ;;  %s1764_s1 = inlined_call_operand.vmem [shape: f32[12,16], index: 1, kind: input, shape index: {}]   ;;  %s1765_s2 = inlined_call_operand.vmem [shape: f32[128,48], index: 2, kind: input, shape index: {}]   ;;  %s1766_s3 = inlined_call_operand.vmem [shape: f32[128,1], index: 3, kind: input, shape index: {}]   ;;  %s1767_s4 = inlined_call_operand.vmem [shape: f32[128,16], index: 4, kind: input, shape index: {}]   ;;  %s1768_s5 = inlined_call_operand.vmem [shape: f32[128,16], index: 5, kind: input, shape index: {}]   ;;  %s1769_s6 = inlined_call_operand.vmem [shape: f32[64,128], index: 6, kind: input, shape index: {}]   ;;  %s1770_s7 = inlined_call_operand.vmem [shape: f32[64,1], index: 7, kind: input, shape index: {}]   ;;  %s1771_s8 = inlined_call_operand.vmem [shape: f32[2,64,16], index: 8, kind: output, shape index: {}]  }
   0x1 LB: > { %s1115_s28 = sadd.s32 4294967295, %s1397_s27   ;;  %p1119_p0 = scmp.ge.s32.totalorder %s1397_s27, 1  ;;  %s1397_s27 = sphi %s1446_s27, %s18_s27  }
   0x2   : > { %p262_p1 = scmp.lt.s32.totalorder %s1397_s27, 3 }
   0x4   : > { %p263_p2 = pnand %p1119_p0, %p262_p1 }
   0x5   : > { %v312_v0 = vld [vmem:[%s1764_s1] sm:$0xff] (!%p263_p2)  ;;  %v313_v1 = vld [vmem:[%s1764_s1 + $0x8] sm:$0xf] (!%p263_p2)  ;;  %vm333_vm0 = vcmask (!%p263_p2), 1043456   ;;  %p296_p3 = scmp.lt.s32.totalorder (!%p263_p2), %s1115_s28, 1  ;;  %vm1399_vm1 = vmmov (!%p263_p2), 1  }
   0x6   : > { %266 = sbr.rel (%p263_p2) target bundleno = 1046 (0x416), region = 52  ;;  %v1296_v2 = vpack.c.bf16 (!%p263_p2), %v313_v1, %v312_v0  ;;  %vm1297_vm2 = vmpackc.low (!%p263_p2), %vm333_vm0, %vm1399_vm1  ;;  %vm314_vm3 = vcmask (!%p263_p2), 97280   ;;  %v432_v9 = vld [vmem:[%s1765_s2] sm:$0xff] (!%p263_p2)  ;;  %vm544_vm4 = vcmask (!%p263_p2), 392192   ;;  %v450_v11 = vld [vmem:[%s1766_s3 + $0x10] sm:$0xff] (!%p263_p2)  ;;  %v1400_v12 = vmov (!%p263_p2), 0  }
   0x7   : > { %v448_v10 = vld [vmem:[%s1766_s3] sm:$0xff] (!%p263_p2)  ;;  %1357 = vset.pattern.permute.xlu0 (!%p263_p2), %v1400_v12  ;;  %1358 = vset.pattern.permute.xlu1 (!%p263_p2), %v1400_v12  ;;  %v449_v13 = vld [vmem:[%s1766_s3 + $0x8] sm:$0xff] (!%p263_p2)  ;;  %v451_v14 = vld [vmem:[%s1766_s3 + $0x18] sm:$0xff] (!%p263_p2)  ;;  %vm963_vm5 = vcmask (!%p263_p2), 130048  }
   0x8   : > { %1298 = vmatprep.subr.msk.bf16.mxu1 (!%p263_p2), %vm1297_vm2, %v1296_v2  ;;  %466 = vperm.xlu0 (!%p263_p2), %1357, %v448_v10   ;;  %v452_v15 = vld [vmem:[%s1766_s3 + $0x20] sm:$0xff] (!%p263_p2)  ;;  %v453_v16 = vld [vmem:[%s1766_s3 + $0x28] sm:$0xff] (!%p263_p2)  ;;  %v454_v17 = vld [vmem:[%s1766_s3 + $0x30] sm:$0xff] (!%p263_p2) }
   0x9   : > { %1301 = vmatpush3.bf16.msk.msra.mxu1 (!%p263_p2), %vm1297_vm2, %v1296_v2  ;;  %476 = vperm.xlu1 (!%p263_p2), %1358, %v450_v11   ;;  %v455_v18 = vld [vmem:[%s1766_s3 + $0x38] sm:$0xff] (!%p263_p2)  ;;  %v456_v19 = vld [vmem:[%s1766_s3 + $0x40] sm:$0xff] (!%p263_p2)  ;;  %v457_v20 = vld [vmem:[%s1766_s3 + $0x48] sm:$0xff] (!%p263_p2) }
   0xa   : > { %v458_v21 = vld [vmem:[%s1766_s3 + $0x50] sm:$0xff] (!%p263_p2)  ;;  %v459_v22 = vld [vmem:[%s1766_s3 + $0x58] sm:$0xff] (!%p263_p2)  ;;  %v460_v23 = vld [vmem:[%s1766_s3 + $0x60] sm:$0xff] (!%p263_p2) }
   0xb   : > { %v461_v24 = vld [vmem:[%s1766_s3 + $0x68] sm:$0xff] (!%p263_p2)  ;;  %v462_v25 = vld [vmem:[%s1766_s3 + $0x70] sm:$0xff] (!%p263_p2)  ;;  %v463_v26 = vld [vmem:[%s1766_s3 + $0x78] sm:$0xff] (!%p263_p2) }
   0xc   : > { %471 = vperm.xlu0 (!%p263_p2), %1357, %v449_v13   ;;  %v810_v27 = vld [vmem:[%s1770_s7] sm:$0xff] (!%p263_p2)  ;;  %v811_v28 = vld [vmem:[%s1770_s7 + $0x8] sm:$0xff] (!%p263_p2)  ;;  %v812_v29 = vld [vmem:[%s1770_s7 + $0x10] sm:$0xff] (!%p263_p2) }
   0xd   : > { %s1773_s28 = smov (!%p296_p3, %s1115_s28), 1  ;;  %481 = vperm.xlu1 %1358, %v451_v14   ;;  %v813_v30 = vld [vmem:[%s1770_s7 + $0x18] sm:$0xff]  ;;  %v814_v31 = vld [vmem:[%s1770_s7 + $0x20] sm:$0xff]  ;;  %v815_v32 = vld [vmem:[%s1770_s7 + $0x28] sm:$0xff] }
   0xe   : > { %s1346_s11 = smul.u32 48, %s1773_s28  ;;  %v816_v33 = vld [vmem:[%s1770_s7 + $0x30] sm:$0xff]  ;;  %v817_v34 = vld [vmem:[%s1770_s7 + $0x38] sm:$0xff]  ;;  %v433_v44 = vld [vmem:[%s1765_s2 + $0x8] sm:$0xff]  ;;  %s1148_s15 = sshll.u32 %s1773_s28, 6 }
   0xf   : > { %v434_v45 = vld [vmem:[%s1765_s2 + $0x10] sm:$0xff]  ;;  %v435_v46 = vld [vmem:[%s1765_s2 + $0x18] sm:$0xff]  ;;  %v436_v47 = vld [vmem:[%s1765_s2 + $0x20] sm:$0xff]  ;;  %s1742_s18 = scalar_lea.vmem %s1771_s8, %s1148_s15 }
  0x10   : > { %s300_s14 = scalar_lea.vmem %s1763_s0, %s1346_s11  ;;  %486 = vperm.xlu0 %1357, %v452_v15   ;;  %v437_v48 = vld [vmem:[%s1765_s2 + $0x28] sm:$0xff]  ;;  %v438_v49 = vld [vmem:[%s1765_s2 + $0x30] sm:$0xff]  ;;  %v439_v50 = vld [vmem:[%s1765_s2 + $0x38] sm:$0xff] }
  0x11   : > { %v306_v3 = vld [vmem:[%s300_s14] sm:$0xff]  ;;  %v307_v4 = vld [vmem:[%s300_s14 + $0x8] sm:$0xff]  ;;  %v308_v5 = vld [vmem:[%s300_s14 + $0x10] sm:$0xff]  ;;  %491 = vperm.xlu1 %1358, %v453_v16  }
  0x12   : > { %1207 = vmatprep.mubr.msk.f32.mxu1 %vm314_vm3, %v306_v3  ;;  %v309_v6 = vld [vmem:[%s300_s14 + $0x18] sm:$0xff]  ;;  %v310_v7 = vld [vmem:[%s300_s14 + $0x20] sm:$0xff]  ;;  %v311_v8 = vld [vmem:[%s300_s14 + $0x28] sm:$0xff] }
  0x13   : > { %1208 = vmatmul.mubr.msk.f32.vlgmr.msra.gmra.mrb[0].mxu1 %vm314_vm3, %v307_v4  ;;  %v440_v51 = vld [vmem:[%s1765_s2 + $0x40] sm:$0xff]  ;;  %v441_v52 = vld [vmem:[%s1765_s2 + $0x48] sm:$0xff]  ;;  %v442_v53 = vld [vmem:[%s1765_s2 + $0x50] sm:$0xff] }
  0x14   : > { %1210 = vmatprep.mubr.msk.f32.mxu1 %vm314_vm3, %v308_v5  ;;  %496 = vperm.xlu0 %1357, %v454_v17   ;;  %v443_v54 = vld [vmem:[%s1765_s2 + $0x58] sm:$0xff]  ;;  %v444_v55 = vld [vmem:[%s1765_s2 + $0x60] sm:$0xff]  ;;  %v445_v56 = vld [vmem:[%s1765_s2 + $0x68] sm:$0xff] }
  0x15   : > { %501 = vperm.xlu1 %1358, %v455_v18   ;;  %v446_v57 = vld [vmem:[%s1765_s2 + $0x70] sm:$0xff]  ;;  %v447_v58 = vld [vmem:[%s1765_s2 + $0x78] sm:$0xff]  ;;  %v802_v59 = vld [vmem:[%s1769_s6] sm:$0xff] }
  0x16   : > { %1284 = vmatprep.mubr.f32.mxu0 %v802_v59  ;;  %v739_v3 = vld [vmem:[%s1767_s4 + $0x8] sm:$0xff]  ;;  %v770_v10 = vld [vmem:[%s1768_s5] sm:$0xff]  ;;  %v741_v14 = vld [vmem:[%s1767_s4 + $0x18] sm:$0xff] }
  0x17   : > { %1211 = vmatmul.mubr.msk.f32.gmra.mrb[2].mxu1 %vm314_vm3, %v309_v6  ;;  %v738_v6 = vld [vmem:[%s1767_s4] sm:$0xff]  ;;  %v740_v18 = vld [vmem:[%s1767_s4 + $0x10] sm:$0xff] }
  0x18   : > { %1213 = vmatprep.mubr.msk.f32.mxu1 %vm314_vm3, %v310_v7  ;;  %506 = vperm.xlu0 %1357, %v456_v19  }
  0x19   : > { %511 = vperm.xlu1 %1358, %v457_v20   ;;  %v773_v20 = vld [vmem:[%s1768_s5 + $0x18] sm:$0xff] }
  0x1b   : > { %1214 = vmatmul.mubr.msk.f32.gmra.mrb[4].mxu1 %vm314_vm3, %v311_v8  ;;  %v771_v8 = vld [vmem:[%s1768_s5 + $0x8] sm:$0xff] }
  0x1c   : > { %1228 = vmatprep.mubr.msk.f32.mxu1 %vm544_vm4, %v432_v9  ;;  %516 = vperm.xlu0 %1357, %v458_v21  }
  0x1d   : > { %521 = vperm.xlu1 %1358, %v459_v22  }
  0x20   : > { %526 = vperm.xlu0 %1357, %v460_v23  }
  0x21   : > { %531 = vperm.xlu1 %1358, %v461_v24   ;;  %v772_v24 = vld [vmem:[%s1768_s5 + $0x10] sm:$0xff] }
  0x24   : > { %536 = vperm.xlu0 %1357, %v462_v25  }
  0x25   : > { %541 = vperm.xlu1 %1358, %v463_v26  }
  0x28   : > { %820 = vperm.xlu0 %1357, %v810_v27   ;;  %v743_v27 = vld [vmem:[%s1767_s4 + $0x28] sm:$0xff] }
  0x29   : > { %825 = vperm.xlu1 %1358, %v811_v28  }
  0x2c   : > { %830 = vperm.xlu0 %1357, %v812_v29  }
  0x2d   : > { %835 = vperm.xlu1 %1358, %v813_v30  }
  0x30   : > { %840 = vperm.xlu0 %1357, %v814_v31  }
  0x31   : > { %845 = vperm.xlu1 %1358, %v815_v32   ;;  %v742_v32 = vld [vmem:[%s1767_s4 + $0x20] sm:$0xff] }
  0x34   : > { %850 = vperm.xlu0 %1357, %v816_v33  }
  0x35   : > { %855 = vperm.xlu1 %1358, %v817_v34  }
  0x87   : > { %v467_v61 = vpop.permute.xlu0 %466 }
  0x88   : > { %v477_v60 = vpop.permute.xlu1 %476 }
  0x8b   : > { %v472_v63 = vpop.permute.xlu0 %471 }
  0x8c   : > { %v482_v62 = vpop.permute.xlu1 %481 }
  0x8f   : > { %v487_v1 = vpop.permute.xlu0 %486 }
  0x90   : > { %v492_v0 = vpop.permute.xlu1 %491 }
  0x93   : > { %v497_v15 = vpop.permute.xlu0 %496 }
  0x94   : > { %v502_v11 = vpop.permute.xlu1 %501 }
  0x98   : > { %v512_v33 = vpop.permute.xlu1 %511 }
  0xe6   : > { %v1209_v35 = vpop.f32.mrb[0].mxu1 }
  0xe7   : > { %v403_v36 = vpop.f32.mrb[1].mxu1 }
  0xe8   : > { %v1302_v37 = vpack.c.bf16 %v1209_v35, %v403_v36  ;;  %v775_v35 = vld [vmem:[%s1768_s5 + $0x28] sm:$0xff] }
  0xea   : > { %v1212_v38 = vpop.f32.mrb[2].mxu1  ;;  %1303 = vmatprep.subr.bf16.mxu1 %v1302_v37 }
  0xeb   : > { %v413_v39 = vpop.f32.mrb[3].mxu1  ;;  %1305 = vmatpush3.bf16.msra.mxu1 %v1302_v37  ;;  %v507_v37 = vpop.permute.xlu0 %506 }
  0xec   : > { %v1306_v40 = vpack.c.bf16 %v1212_v38, %v413_v39  ;;  %v774_v39 = vld [vmem:[%s1768_s5 + $0x20] sm:$0xff] }
  0xee   : > { %v1215_v41 = vpop.f32.mrb[4].mxu1  ;;  %1307 = vmatprep.subr.bf16.mxu1 %v1306_v40 }
  0xef   : > { %v423_v42 = vpop.f32.mrb[5].mxu1  ;;  %1309 = vmatpush3.bf16.msra.mxu1 %v1306_v40 }
  0xf0   : > { %v1310_v43 = vpack.c.bf16 %v1215_v41, %v423_v42  ;;  %v745_v42 = vld [vmem:[%s1767_s4 + $0x38] sm:$0xff] }
  0xf2   : > { %1311 = vmatprep.subr.bf16.mxu1 %v1310_v43 }
  0xf3   : > { %1313 = vmatpush3.bf16.msra.mxu1 %v1310_v43 }
  0xf6   : > { %1229 = vmatmul.mubr.msk.f32.vlgmr.msra.gmra.mrb[6].mxu1 %vm544_vm4, %v433_v44 }
  0xf7   : > { %1231 = vmatprep.mubr.msk.f32.mxu1 %vm544_vm4, %v434_v45 }
  0xfa   : > { %1232 = vmatmul.mubr.msk.f32.gmra.mrb[8].mxu1 %vm544_vm4, %v435_v46 }
  0xfb   : > { %1234 = vmatprep.mubr.msk.f32.mxu1 %vm544_vm4, %v436_v47  ;;  %v744_v47 = vld [vmem:[%s1767_s4 + $0x30] sm:$0xff] }
  0xfe   : > { %1235 = vmatmul.mubr.msk.f32.gmra.mrb[10].mxu1 %vm544_vm4, %v437_v48 }
  0xff   : > { %1237 = vmatprep.mubr.msk.f32.mxu1 %vm544_vm4, %v438_v49  ;;  %v777_v49 = vld [vmem:[%s1768_s5 + $0x38] sm:$0xff] }
 0x102   : > { %1238 = vmatmul.mubr.msk.f32.gmra.mrb[12].mxu1 %vm544_vm4, %v439_v50 }
 0x103   : > { %1240 = vmatprep.mubr.msk.f32.mxu1 %vm544_vm4, %v440_v51 }
 0x106   : > { %1241 = vmatmul.mubr.msk.f32.gmra.mrb[14].mxu1 %vm544_vm4, %v441_v52  ;;  %v776_v52 = vld [vmem:[%s1768_s5 + $0x30] sm:$0xff] }
 0x107   : > { %1243 = vmatprep.mubr.msk.f32.mxu1 %vm544_vm4, %v442_v53  ;;  %v522_v53 = vpop.permute.xlu1 %521 }
 0x10a   : > { %1244 = vmatmul.mubr.msk.f32.gmra.mrb[16].mxu1 %vm544_vm4, %v443_v54 }
 0x10b   : > { %1246 = vmatprep.mubr.msk.f32.mxu1 %vm544_vm4, %v444_v55 }
 0x10e   : > { %1247 = vmatmul.mubr.msk.f32.gmra.mrb[18].mxu1 %vm544_vm4, %v445_v56  ;;  %v747_v56 = vld [vmem:[%s1767_s4 + $0x48] sm:$0xff] }
 0x10f   : > { %1249 = vmatprep.mubr.msk.f32.mxu1 %vm544_vm4, %v446_v57 }
 0x112   : > { %1250 = vmatmul.mubr.msk.f32.gmra.mrb[20].mxu1 %vm544_vm4, %v447_v58  ;;  %v517_v58 = vpop.permute.xlu0 %516 }
 0x1c9   : > { %v1230_v2 = vpop.f32.mrb[6].mxu1 }
 0x1ca   : > { %v665_v4 = vadd.f32 %v1230_v2, %v472_v63  ;;  %v659_v5 = vpop.f32.mrb[7].mxu1 }
 0x1cb   : > { %v660_v7 = vadd.f32 %v659_v5, %v467_v61 }
 0x1cc   : > { %v755_v9 = vmul.f32 %v739_v3, %v665_v4  ;;  %v778_v3 = vld [vmem:[%s1768_s5 + $0x40] sm:$0xff] }
 0x1cd   : > { %v754_v12 = vmul.f32 %v738_v6, %v660_v7  ;;  %v1233_v13 = vpop.f32.mrb[8].mxu1  ;;  %v749_v6 = vld [vmem:[%s1767_s4 + $0x58] sm:$0xff] }
 0x1ce   : > { %v675_v16 = vadd.f32 %v1233_v13, %v482_v62  ;;  %v669_v17 = vpop.f32.mrb[9].mxu1  ;;  %v787_v19 = vadd.f32 %v771_v8, %v755_v9  ;;  %v746_v62 = vld [vmem:[%s1767_s4 + $0x40] sm:$0xff] }
 0x1cf   : > { %v670_v21 = vadd.f32 %v669_v17, %v477_v60  ;;  %v786_v22 = vadd.f32 %v770_v10, %v754_v12  ;;  %v532_v12 = vpop.permute.xlu1 %531 }
 0x1d0   : > { %v757_v23 = vmul.f32 %v741_v14, %v675_v16  ;;  %v781_v14 = vld [vmem:[%s1768_s5 + $0x58] sm:$0xff]  ;;  %v527_v16 = vpop.permute.xlu0 %526 }
 0x1d1   : > { %v756_v25 = vmul.f32 %v740_v18, %v670_v21  ;;  %v1236_v26 = vpop.f32.mrb[10].mxu1  ;;  %v1314_v28 = vpack.c.bf16 %v787_v19, %v786_v22  ;;  %v780_v18 = vld [vmem:[%s1768_s5 + $0x50] sm:$0xff]  ;;  %v751_v21 = vld [vmem:[%s1767_s4 + $0x68] sm:$0xff] }
 0x1d2   : > { %v789_v29 = vadd.f32 %v773_v20, %v757_v23  ;;  %v685_v30 = vadd.f32 %v1236_v26, %v492_v0  ;;  %v679_v31 = vpop.f32.mrb[11].mxu1  ;;  %v779_v0 = vld [vmem:[%s1768_s5 + $0x48] sm:$0xff]  ;;  %v750_v26 = vld [vmem:[%s1767_s4 + $0x60] sm:$0xff] }
 0x1d3   : > { %v788_v34 = vadd.f32 %v772_v24, %v756_v25  ;;  %v680_v36 = vadd.f32 %v679_v31, %v487_v1  ;;  %1315 = vmatprep.subr.bf16.mxu0 %v1314_v28  ;;  %v782_v31 = vld [vmem:[%s1768_s5 + $0x60] sm:$0xff] }
 0x1d4   : > { %v759_v38 = vmul.f32 %v743_v27, %v685_v30  ;;  %1317 = vmatpush3.bf16.msra.mxu0 %v1314_v28  ;;  %v783_v28 = vld [vmem:[%s1768_s5 + $0x68] sm:$0xff] }
 0x1d5   : > { %v758_v40 = vmul.f32 %v742_v32, %v680_v36  ;;  %v1239_v41 = vpop.f32.mrb[12].mxu1  ;;  %v1318_v43 = vpack.c.bf16 %v789_v29, %v788_v34  ;;  %v542_v32 = vpop.permute.xlu1 %541 }
 0x1d6   : > { %v791_v44 = vadd.f32 %v775_v35, %v759_v38  ;;  %v695_v45 = vadd.f32 %v1239_v41, %v502_v11  ;;  %v689_v46 = vpop.f32.mrb[13].mxu1  ;;  %v748_v11 = vld [vmem:[%s1767_s4 + $0x50] sm:$0xff]  ;;  %v753_v35 = vld [vmem:[%s1767_s4 + $0x78] sm:$0xff] }
 0x1d7   : > { %v790_v48 = vadd.f32 %v774_v39, %v758_v40  ;;  %v690_v50 = vadd.f32 %v689_v46, %v497_v15  ;;  %1319 = vmatprep.subr.bf16.mxu0 %v1318_v43  ;;  %v752_v41 = vld [vmem:[%s1767_s4 + $0x70] sm:$0xff] }
 0x1d8   : > { %v761_v51 = vmul.f32 %v745_v42, %v695_v45  ;;  %1321 = vmatpush3.bf16.msra.mxu0 %v1318_v43  ;;  %v785_v43 = vld [vmem:[%s1768_s5 + $0x78] sm:$0xff]  ;;  %v784_v46 = vld [vmem:[%s1768_s5 + $0x70] sm:$0xff] }
 0x1d9   : > { %v760_v54 = vmul.f32 %v744_v47, %v690_v50  ;;  %v1242_v55 = vpop.f32.mrb[14].mxu1  ;;  %v1322_v57 = vpack.c.bf16 %v791_v44, %v790_v48 }
 0x1da   : > { %v793_v59 = vadd.f32 %v777_v49, %v761_v51  ;;  %v705_v60 = vadd.f32 %v1242_v55, %v512_v33  ;;  %v699_v61 = vpop.f32.mrb[15].mxu1  ;;  %v806_v55 = vld [vmem:[%s1769_s6 + $0x20] sm:$0xff] }
 0x1db   : > { %v792_v63 = vadd.f32 %v776_v52, %v760_v54  ;;  %v700_v1 = vadd.f32 %v699_v61, %v507_v37  ;;  %1323 = vmatprep.subr.bf16.mxu0 %v1322_v57  ;;  %v537_v37 = vpop.permute.xlu0 %536  ;;  %v803_v52 = vld [vmem:[%s1769_s6 + $0x8] sm:$0xff]  ;;  %v805_v54 = vld [vmem:[%s1769_s6 + $0x18] sm:$0xff] }
 0x1dc   : > { %v763_v2 = vmul.f32 %v747_v56, %v705_v60  ;;  %1325 = vmatpush3.bf16.msra.mxu0 %v1322_v57  ;;  %v807_v56 = vld [vmem:[%s1769_s6 + $0x28] sm:$0xff]  ;;  %v808_v57 = vld [vmem:[%s1769_s6 + $0x30] sm:$0xff]  ;;  %v826_v60 = vpop.permute.xlu1 %825 }
 0x1dd   : > { %v762_v4 = vmul.f32 %v746_v62, %v700_v1  ;;  %v1245_v5 = vpop.f32.mrb[16].mxu1  ;;  %v1326_v7 = vpack.c.bf16 %v793_v59, %v792_v63 }
 0x1de   : > { %v795_v8 = vadd.f32 %v779_v0, %v763_v2  ;;  %v715_v9 = vadd.f32 %v1245_v5, %v522_v53  ;;  %v709_v10 = vpop.f32.mrb[17].mxu1  ;;  %v804_v53 = vld [vmem:[%s1769_s6 + $0x10] sm:$0xff] }
 0x1df   : > { %v794_v13 = vadd.f32 %v778_v3, %v762_v4  ;;  %v710_v15 = vadd.f32 %v709_v10, %v517_v58  ;;  %1327 = vmatprep.subr.bf16.mxu0 %v1326_v7  ;;  %v809_v58 = vld [vmem:[%s1769_s6 + $0x38] sm:$0xff]  ;;  %v821_v59 = vpop.permute.xlu0 %820 }
 0x1e0   : > { %v765_v17 = vmul.f32 %v749_v6, %v715_v9  ;;  %1329 = vmatpush3.bf16.msra.mxu0 %v1326_v7  ;;  %v836_v2 = vpop.permute.xlu1 %835 }
 0x1e1   : > { %v764_v19 = vmul.f32 %v748_v11, %v710_v15  ;;  %v1248_v20 = vpop.f32.mrb[18].mxu1  ;;  %v1330_v22 = vpack.c.bf16 %v795_v8, %v794_v13 }
 0x1e2   : > { %v797_v23 = vadd.f32 %v781_v14, %v765_v17  ;;  %v725_v24 = vadd.f32 %v1248_v20, %v532_v12  ;;  %v719_v25 = vpop.f32.mrb[19].mxu1 }
 0x1e3   : > { %v796_v27 = vadd.f32 %v780_v18, %v764_v19  ;;  %v720_v29 = vadd.f32 %v719_v25, %v527_v16  ;;  %1331 = vmatprep.subr.bf16.mxu0 %v1330_v22  ;;  %v831_v62 = vpop.permute.xlu0 %830 }
 0x1e4   : > { %v767_v30 = vmul.f32 %v751_v21, %v725_v24  ;;  %1333 = vmatpush3.bf16.msra.mxu0 %v1330_v22  ;;  %v846_v12 = vpop.permute.xlu1 %845 }
 0x1e5   : > { %v766_v33 = vmul.f32 %v750_v26, %v720_v29  ;;  %v1251_v34 = vpop.f32.mrb[20].mxu1  ;;  %v1334_v36 = vpack.c.bf16 %v797_v23, %v796_v27 }
 0x1e6   : > { %v799_v38 = vadd.f32 %v783_v28, %v767_v30  ;;  %v735_v39 = vadd.f32 %v1251_v34, %v542_v32  ;;  %v729_v40 = vpop.f32.mrb[21].mxu1 }
 0x1e7   : > { %v798_v42 = vadd.f32 %v782_v31, %v766_v33  ;;  %v730_v44 = vadd.f32 %v729_v40, %v537_v37  ;;  %1335 = vmatprep.subr.bf16.mxu0 %v1334_v36  ;;  %v841_v8 = vpop.permute.xlu0 %840 }
 0x1e8   : > { %v769_v45 = vmul.f32 %v753_v35, %v735_v39  ;;  %1337 = vmatpush3.bf16.msra.mxu0 %v1334_v36  ;;  %v856_v22 = vpop.permute.xlu1 %855 }
 0x1e9   : > { %v768_v47 = vmul.f32 %v752_v41, %v730_v44  ;;  %v1338_v48 = vpack.c.bf16 %v799_v38, %v798_v42 }
 0x1ea   : > { %v801_v49 = vadd.f32 %v785_v43, %v769_v45 }
 0x1eb   : > { %v800_v50 = vadd.f32 %v784_v46, %v768_v47  ;;  %1339 = vmatprep.subr.bf16.mxu0 %v1338_v48  ;;  %v851_v19 = vpop.permute.xlu0 %850 }
 0x1ec   : > { %1341 = vmatpush3.bf16.msra.mxu0 %v1338_v48 }
 0x1ed   : > { %v1342_v51 = vpack.c.bf16 %v801_v49, %v800_v50 }
 0x1ef   : > { %1343 = vmatprep.subr.bf16.mxu0 %v1342_v51 }
 0x1f0   : > { %1345 = vmatpush3.bf16.msra.mxu0 %v1342_v51 }
 0x1f3   : > { %1285 = vmatmul.mubr.f32.vlgmr.msra.gmra.mrb[0].mxu0 %v803_v52 }
 0x1f4   : > { %1287 = vmatprep.mubr.f32.mxu0 %v804_v53 }
 0x1f7   : > { %1288 = vmatmul.mubr.f32.gmra.mrb[2].mxu0 %v805_v54 }
 0x1f8   : > { %1290 = vmatprep.mubr.f32.mxu0 %v806_v55 }
 0x1fb   : > { %1291 = vmatmul.mubr.f32.gmra.mrb[4].mxu0 %v807_v56 }
 0x1fc   : > { %1293 = vmatprep.mubr.f32.mxu0 %v808_v57 }
 0x1ff   : > { %1294 = vmatmul.mubr.f32.gmra.mrb[6].mxu0 %v809_v58 }
 0x2c6   : > { %v1286_v61 = vpop.f32.mrb[0].mxu0 }
 0x2c7   : > { %v930_v63 = vadd.f32 %v1286_v61, %v826_v60  ;;  %v924_v0 = vpop.f32.mrb[1].mxu0 }
 0x2c8   : > { %v925_v1 = vadd.f32 %v924_v0, %v821_v59 }
 0x2c9   : > { %v967_v3 = vsel %vm963_vm5, %v930_v63, -inf }
 0x2ca   : > { %968 = vmax.xlane.f32.xlu1 %v967_v3  ;;  %v1289_v4 = vpop.f32.mrb[2].mxu0  ;;  %v964_v5 = vsel %vm963_vm5, %v925_v1, -inf }
 0x2cb   : > { %v940_v6 = vadd.f32 %v1289_v4, %v836_v2  ;;  %v934_v7 = vpop.f32.mrb[3].mxu0  ;;  %965 = vmax.xlane.f32.xlu0 %v964_v5 }
 0x2cc   : > { %v935_v10 = vadd.f32 %v934_v7, %v831_v62 }
 0x2cd   : > { %v973_v9 = vsel %vm963_vm5, %v940_v6, -inf }
 0x2ce   : > { %v1292_v11 = vpop.f32.mrb[4].mxu0  ;;  %v970_v18 = vsel %vm963_vm5, %v935_v10, -inf }
 0x2cf   : > { %v944_v13 = vpop.f32.mrb[5].mxu0  ;;  %974 = vmax.xlane.f32.xlu0 %v973_v9  ;;  %v950_v15 = vadd.f32 %v1292_v11, %v846_v12 }
 0x2d0   : > { %v945_v14 = vadd.f32 %v944_v13, %v841_v8 }
 0x2d1   : > { %v979_v25 = vsel %vm963_vm5, %v950_v15, -inf }
 0x2d2   : > { %v1295_v16 = vpop.f32.mrb[6].mxu0  ;;  %v976_v17 = vsel %vm963_vm5, %v945_v14, -inf }
 0x2d3   : > { %v954_v20 = vpop.f32.mrb[7].mxu0  ;;  %977 = vmax.xlane.f32.xlu1 %v976_v17  ;;  %971 = vmax.xlane.f32.xlu0 %v970_v18  ;;  %v960_v23 = vadd.f32 %v1295_v16, %v856_v22 }
 0x2d4   : > { %v955_v21 = vadd.f32 %v954_v20, %v851_v19 }
 0x2d5   : > { %v985_v26 = vsel %vm963_vm5, %v960_v23, -inf }
 0x2d6   : > { %v982_v24 = vsel %vm963_vm5, %v955_v21, -inf }
 0x2d7   : > { %983 = vmax.xlane.f32.xlu1 %v982_v24  ;;  %980 = vmax.xlane.f32.xlu0 %v979_v25 }
 0x2db   : > { %986 = vmax.xlane.f32.xlu0 %v985_v26 }
 0x357   : > { %v969_v27 = vpop.xlane.xlu1 %968 }
 0x358   : > { %v989_v28 = vsub.f32 %v930_v63, %v969_v27  ;;  %v966_v29 = vpop.xlane.xlu0 %965 }
 0x359   : > { %v988_v30 = vsub.f32 %v925_v1, %v966_v29 }
 0x35a   : > { %v998_v31 = vmul.f32 1.442695, %v989_v28 }
 0x35b   : > { %v996_v32 = vmul.f32 1.442695, %v988_v30 }
 0x35c   : > { %1359 = vpow2.f32 %v998_v31  ;;  %v975_v33 = vpop.xlane.xlu0 %974 }
 0x35d   : > { %1361 = vpow2.f32 %v996_v32  ;;  %v991_v34 = vsub.f32 %v940_v6, %v975_v33 }
 0x35f   : > { %v1002_v35 = vmul.f32 1.442695, %v991_v34 }
 0x360   : > { %v978_v36 = vpop.xlane.xlu1 %977  ;;  %v972_v37 = vpop.xlane.xlu0 %971 }
 0x361   : > { %1363 = vpow2.f32 %v1002_v35  ;;  %v992_v38 = vsub.f32 %v945_v14, %v978_v36  ;;  %v990_v39 = vsub.f32 %v935_v10, %v972_v37 }
 0x363   : > { %v1000_v40 = vmul.f32 1.442695, %v990_v39  ;;  %v1004_v41 = vmul.f32 1.442695, %v992_v38 }
 0x364   : > { %v984_v42 = vpop.xlane.xlu1 %983  ;;  %v981_v43 = vpop.xlane.xlu0 %980 }
 0x365   : > { %v994_v44 = vsub.f32 %v955_v21, %v984_v42  ;;  %v993_v45 = vsub.f32 %v950_v15, %v981_v43  ;;  %1365 = vpow2.f32 %v1000_v40 }
 0x366   : > { %v1360_v46 = vpop.eup %1359  ;;  %1367 = vpow2.f32 %v1004_v41 }
 0x367   : > { %v1362_v47 = vpop.eup %1361  ;;  %v1006_v48 = vmul.f32 1.442695, %v993_v45  ;;  %v1015_v49 = vsel %vm963_vm5, %v1360_v46, 0.0  ;;  %v1008_v50 = vmul.f32 1.442695, %v994_v44 }
 0x368   : > { %1016 = vadd.xlane.f32.xlu0 %v1015_v49  ;;  %v987_v51 = vpop.xlane.xlu0 %986  ;;  %v1012_v52 = vsel %vm963_vm5, %v1362_v47, 0.0 }
 0x369   : > { %v995_v53 = vsub.f32 %v960_v23, %v987_v51  ;;  %1013 = vadd.xlane.f32.xlu1 %v1012_v52  ;;  %1369 = vpow2.f32 %v1006_v48 }
 0x36a   : > { %1371 = vpow2.f32 %v1008_v50 }
 0x36b   : > { %v1364_v54 = vpop.eup %1363  ;;  %v1010_v55 = vmul.f32 1.442695, %v995_v53 }
 0x36c   : > { %v1021_v56 = vsel %vm963_vm5, %v1364_v54, 0.0 }
 0x36d   : > { %1373 = vpow2.f32 %v1010_v55  ;;  %1022 = vadd.xlane.f32.xlu0 %v1021_v56 }
 0x36f   : > { %v1366_v57 = vpop.eup %1365 }
 0x370   : > { %v1018_v58 = vsel %vm963_vm5, %v1366_v57, 0.0  ;;  %v1368_v59 = vpop.eup %1367 }
 0x371   : > { %1019 = vadd.xlane.f32.xlu1 %v1018_v58  ;;  %v1024_v61 = vsel %vm963_vm5, %v1368_v59, 0.0 }
 0x373   : > { %v1370_v60 = vpop.eup %1369 }
 0x374   : > { %v1027_v62 = vsel %vm963_vm5, %v1370_v60, 0.0  ;;  %v1372_v63 = vpop.eup %1371 }
 0x375   : > { %1025 = vadd.xlane.f32.xlu1 %v1024_v61  ;;  %1028 = vadd.xlane.f32.xlu0 %v1027_v62  ;;  %v1030_v2 = vsel %vm963_vm5, %v1372_v63, 0.0 }
 0x377   : > { %v1374_v0 = vpop.eup %1373 }
 0x378   : > { %v1033_v1 = vsel %vm963_vm5, %v1374_v0, 0.0 }
 0x379   : > { %1031 = vadd.xlane.f32.xlu1 %v1030_v2  ;;  %1034 = vadd.xlane.f32.xlu0 %v1033_v1 }
 0x3f5   : > { %v1017_v3 = vpop.xlane.xlu0 %1016 }
 0x3f6   : > { %1375 = vrcp.f32 %v1017_v3  ;;  %v1014_v4 = vpop.xlane.xlu1 %1013 }
 0x3f7   : > { %1377 = vrcp.f32 %v1014_v4 }
 0x3fa   : > { %v1023_v5 = vpop.xlane.xlu0 %1022 }
 0x3fb   : > { %1379 = vrcp.f32 %v1023_v5 }
 0x3fe   : > { %v1020_v6 = vpop.xlane.xlu1 %1019 }
 0x3ff   : > { %1381 = vrcp.f32 %v1020_v6 }
 0x400   : > { %v1376_v7 = vpop.eup %1375 }
 0x401   : > { %v1378_v8 = vpop.eup %1377  ;;  %v1045_v9 = vmul.f32 %v1376_v7, %v1360_v46 }
 0x402   : > { %v1044_v10 = vmul.f32 %v1378_v8, %v1362_v47  ;;  %v1026_v11 = vpop.xlane.xlu1 %1025  ;;  %v1029_v12 = vpop.xlane.xlu0 %1028 }
 0x403   : > { %1053 = vst.msk [vmem:[%s1742_s18 + $0x8] sm:$0xff] %vm963_vm5, %v1045_v9  ;;  %1383 = vrcp.f32 %v1026_v11 }
 0x404   : > { %1052 = vst.msk [vmem:[%s1742_s18] sm:$0xff] %vm963_vm5, %v1044_v10  ;;  %1385 = vrcp.f32 %v1029_v12 }
 0x405   : > { %v1380_v13 = vpop.eup %1379 }
 0x406   : > { %v1047_v14 = vmul.f32 %v1380_v13, %v1364_v54  ;;  %v1032_v15 = vpop.xlane.xlu1 %1031  ;;  %v1035_v16 = vpop.xlane.xlu0 %1034 }
 0x407   : > { %1387 = vrcp.f32 %v1032_v15 }
 0x408   : > { %1055 = vst.msk [vmem:[%s1742_s18 + $0x18] sm:$0xff] %vm963_vm5, %v1047_v14  ;;  %1389 = vrcp.f32 %v1035_v16 }
 0x409   : > { %v1382_v17 = vpop.eup %1381 }
 0x40a   : > { %v1046_v18 = vmul.f32 %v1382_v17, %v1366_v57 }
 0x40c   : > { %1054 = vst.msk [vmem:[%s1742_s18 + $0x10] sm:$0xff] %vm963_vm5, %v1046_v18 }
 0x40d   : > { %v1384_v19 = vpop.eup %1383 }
 0x40e   : > { %v1386_v20 = vpop.eup %1385  ;;  %v1048_v21 = vmul.f32 %v1384_v19, %v1368_v59 }
 0x40f   : > { %v1049_v22 = vmul.f32 %v1386_v20, %v1370_v60 }
 0x410   : > { %1056 = vst.msk [vmem:[%s1742_s18 + $0x20] sm:$0xff] %vm963_vm5, %v1048_v21 }
 0x411   : > { %v1388_v23 = vpop.eup %1387  ;;  %1057 = vst.msk [vmem:[%s1742_s18 + $0x28] sm:$0xff] %vm963_vm5, %v1049_v22 }
 0x412   : > { %v1390_v24 = vpop.eup %1389  ;;  %v1050_v25 = vmul.f32 %v1388_v23, %v1372_v63 }
 0x413   : > { %v1051_v26 = vmul.f32 %v1390_v24, %v1374_v0 }
 0x414   : > { %1058 = vst.msk [vmem:[%s1742_s18 + $0x30] sm:$0xff] %vm963_vm5, %v1050_v25 }
 0x415   : > { %1059 = vst.msk [vmem:[%s1742_s18 + $0x38] sm:$0xff] %vm963_vm5, %v1051_v26 }
 0x416 PF: > { %s18_s27 = sadd.s32 1, %s1397_s27  }
 0x417   : > { %p15_p4 = scmp.ge.s32.totalorder %s18_s27, 4  }
 0x419   :  { %17 = sbr.rel (!%p15_p4) target bundleno = 1 (0x1), region = 82 }

</bundles_post_ra>
